<compile_context>
chip_gen: v7x
topology: tpu7x:2x2x1
jax: 0.10.0
libtpu: 0.0.40
codegen_flags: <defaults>
</compile_context>

<pallas_src>
import functools

import jax
import jax.numpy as jnp
from jax.experimental import pallas as pl
from jax.experimental.pallas import tpu as pltpu

INPUT_DIM = 14
HIDDEN = 128
NUM_HIDDEN_LAYERS = 4          # common2..common5
NEG_SLOPE = 0.01               # F.leaky_relu default


def _leaky_relu(x):
    return jnp.where(x > 0, x, NEG_SLOPE * x)


def _mlp_kernel(x_ref, w1_ref, b1_ref, wh_ref, bh_ref, o_ref):
    # x_ref: (tb, 14) f32 tile of the batch.
    # w1_ref: (14, 128) bf16, b1_ref: (1, 128) f32
    # wh_ref: (4, 128, 128) bf16 (layers 2..5), bh_ref: (4, 128) f32
    x = x_ref[...].astype(jnp.bfloat16)          # bf16 operands -> native MXU
    h = jnp.dot(x, w1_ref[...],
                preferred_element_type=jnp.float32) + b1_ref[...]
    h = _leaky_relu(h)
    for j in range(NUM_HIDDEN_LAYERS):           # static unroll (4 layers)
        h = jnp.dot(h.astype(jnp.bfloat16), wh_ref[j],
                    preferred_element_type=jnp.float32) + bh_ref[j]
        h = _leaky_relu(h)
    o_ref[...] = h.astype(o_ref.dtype)


def _round_up(v, m):
    return -(-v // m) * m


def _pick_tile(batch, tile_b):
    """Sublane/lane-aligned batch tile; prefer >=2 grid steps for v7x megacore."""
    if batch <= 128:
        return max(8, _round_up(batch, 8))       # unmasked stores, clean layout
    if batch <= 2 * tile_b:
        # split into (at least) two grid steps so both v7x TensorCores get work
        return _round_up(_round_up(batch, 2) // 2, 128)
    return tile_b                                 # large batch: fixed tile


@functools.partial(jax.jit, static_argnames=("tile_b", "out_dtype"))
def vitalsign_feature_mel_thickness(x, packed_params, *, tile_b=1024,
                                    out_dtype=jnp.float32):
    """x: (B, 14) float32. packed_params: (w1_bf16, b1_f32, wh_bf16, bh_f32)."""
    w1, b1, wh, bh = packed_params
    B, D = x.shape
    assert D == INPUT_DIM

    tb = _pick_tile(B, tile_b)                   # tile_b<=1024 keeps v5e happy
    Bp = _round_up(B, tb)
    if Bp != B:
        x = jnp.pad(x, ((0, Bp - B), (0, 0)))

    out = pl.pallas_call(
        _mlp_kernel,
        out_shape=jax.ShapeDtypeStruct((Bp, HIDDEN), out_dtype),
        grid_spec=pltpu.PrefetchScalarGridSpec(
            num_scalar_prefetch=0,
            grid=(Bp // tb,),
            in_specs=[
                pl.BlockSpec((tb, INPUT_DIM), lambda i: (i, 0)),
                # weights/biases: constant index_map -> resident across steps
                pl.BlockSpec((INPUT_DIM, HIDDEN), lambda i: (0, 0)),
                pl.BlockSpec((1, HIDDEN), lambda i: (0, 0)),
                pl.BlockSpec((NUM_HIDDEN_LAYERS, HIDDEN, HIDDEN),
                             lambda i: (0, 0, 0)),
                pl.BlockSpec((NUM_HIDDEN_LAYERS, HIDDEN), lambda i: (0, 0)),
            ],
            out_specs=pl.BlockSpec((tb, HIDDEN), lambda i: (i, 0)),
        ),
        compiler_params=pltpu.CompilerParams(
            dimension_semantics=("parallel",)),
    )(x, w1, b1, wh, bh)

    return out[:B]


def init_params(key):
    """Init mimicking nn.Linear default (uniform +/- 1/sqrt(fan_in)), f32."""
    params = {}
    dims = [(INPUT_DIM, HIDDEN)] + [(HIDDEN, HIDDEN)] * NUM_HIDDEN_LAYERS
    for k, (fan_in, fan_out) in enumerate(dims, start=1):
        key, kw, kb = jax.random.split(key, 3)
        bound = 1.0 / (fan_in ** 0.5)
        # stored as (in_features, out_features) == PyTorch weight transposed
        params[f"w{k}"] = jax.random.uniform(
            kw, (fan_in, fan_out), jnp.float32, -bound, bound)
        params[f"b{k}"] = jax.random.uniform(
            kb, (1, fan_out), jnp.float32, -bound, bound)
    return params


def pack_params(params):
    """Cast weights to bf16 and pack the four hidden layers into single arrays."""
    w1 = params["w1"].astype(jnp.bfloat16)                       # (14, 128)
    b1 = params["b1"].astype(jnp.float32)                        # (1, 128)
    wh = jnp.stack([params[f"w{k}"] for k in range(2, 6)]
                   ).astype(jnp.bfloat16)                        # (4, 128, 128)
    bh = jnp.concatenate([params[f"b{k}"] for k in range(2, 6)],
                         axis=0).astype(jnp.float32)             # (4, 128)
    return (w1, b1, wh, bh)


def _reference_f32(x, params):
    h = x
    for k in range(1, 6):
        h = h @ params[f"w{k}"] + params[f"b{k}"]
        h = jnp.where(h > 0, h, NEG_SLOPE * h)
    return h


def _reference_bf16(x, params):
    """Same precision recipe as the kernel (bf16 operands, f32 accumulate)."""
    h = x
    for k in range(1, 6):
        h = jnp.dot(h.astype(jnp.bfloat16),
                    params[f"w{k}"].astype(jnp.bfloat16),
                    preferred_element_type=jnp.float32) + params[f"b{k}"]
        h = jnp.where(h > 0, h, NEG_SLOPE * h)
    return h


if __name__ == "__main__":
    key = jax.random.PRNGKey(0)
    kx, kp = jax.random.split(key)

    B = 8  # small demo batch
    x = jax.random.normal(kx, (B, INPUT_DIM), jnp.float32)
    params = init_params(kp)
    packed = pack_params(params)

    out = vitalsign_feature_mel_thickness(x, packed)
    out = jax.block_until_ready(out)
    assert out.shape == (B, HIDDEN), out.shape

    # Tight check against a same-precision (bf16-operand) reference.
    ref_bf16 = _reference_bf16(x, params)
    assert jnp.allclose(out, ref_bf16, atol=2e-3, rtol=2e-3), float(
        jnp.max(jnp.abs(out - ref_bf16)))

    # Loose check against the full-f32 PyTorch-equivalent math.
    ref_f32 = _reference_f32(x, params)
    assert jnp.allclose(out, ref_f32, atol=5e-2, rtol=5e-2), float(
        jnp.max(jnp.abs(out - ref_f32)))

    print("KERNEL_OK")
</pallas_src>

<mosaic_0001>
module attributes {stable_mosaic.version = 11 : i64} {
  func.func @_mlp_kernel(%arg0: i32, %arg1: memref<8x14xf32, #tpu.memory_space<vmem>>, %arg2: memref<14x128xbf16, #tpu.memory_space<vmem>>, %arg3: memref<1x128xf32, #tpu.memory_space<vmem>>, %arg4: memref<4x128x128xbf16, #tpu.memory_space<vmem>>, %arg5: memref<4x128xf32, #tpu.memory_space<vmem>>, %arg6: memref<8x128xf32, #tpu.memory_space<vmem>>) attributes {dimension_semantics = [#tpu.dimension_semantics<parallel>], iteration_bounds = array<i64: 1>, scalar_prefetch = 0 : i64, scratch_operands = 0 : i64, tpu.core_type = #tpu.core_type<tc>, window_params = [{transform_indices = @transform_0, window_bounds = array<i64: 8, 14>}, {pipeline_mode = #tpu.pipeline_mode<synchronous>, transform_indices = @transform_1, window_bounds = array<i64: 14, 128>}, {pipeline_mode = #tpu.pipeline_mode<synchronous>, transform_indices = @transform_2, window_bounds = array<i64: 1, 128>}, {pipeline_mode = #tpu.pipeline_mode<synchronous>, transform_indices = @transform_3, window_bounds = array<i64: 4, 128, 128>}, {pipeline_mode = #tpu.pipeline_mode<synchronous>, transform_indices = @transform_4, window_bounds = array<i64: 4, 128>}, {transform_indices = @transform_5, window_bounds = array<i64: 8, 128>}]} {
    %c0 = arith.constant 0 : index
    %c0_0 = arith.constant 0 : index
    %0 = vector.load %arg1[%c0, %c0_0] : memref<8x14xf32, #tpu.memory_space<vmem>>, vector<8x14xf32>
    %1 = arith.truncf %0 : vector<8x14xf32> to vector<8x14xbf16>
    %c0_1 = arith.constant 0 : index
    %c0_2 = arith.constant 0 : index
    %2 = vector.load %arg2[%c0_1, %c0_2] : memref<14x128xbf16, #tpu.memory_space<vmem>>, vector<14x128xbf16>
    %cst = arith.constant dense<0.000000e+00> : vector<8x128xf32>
    %3 = tpu.matmul %1, %2, %cst {dimension_numbers = #tpu.dot_dimension_numbers<[1], [0], [0], [1], [0, 0, 1, 1], [], []>} : vector<8x14xbf16>, vector<14x128xbf16>, vector<8x128xf32> -> vector<8x128xf32>
    %c0_3 = arith.constant 0 : index
    %c0_4 = arith.constant 0 : index
    %4 = vector.load %arg3[%c0_3, %c0_4] : memref<1x128xf32, #tpu.memory_space<vmem>>, vector<1x128xf32>
    %5 = vector.broadcast %4 : vector<1x128xf32> to vector<8x128xf32>
    %6 = arith.addf %3, %5 : vector<8x128xf32>
    %cst_5 = arith.constant 0.000000e+00 : f32
    %7 = vector.broadcast %cst_5 : f32 to vector<8x128xf32>
    %8 = arith.cmpf ogt, %6, %7 : vector<8x128xf32>
    %cst_6 = arith.constant 0.00999999977 : f32
    %9 = vector.broadcast %cst_6 : f32 to vector<8x128xf32>
    %10 = arith.mulf %9, %6 : vector<8x128xf32>
    %11 = arith.select %8, %6, %10 : vector<8x128xi1>, vector<8x128xf32>
    %12 = arith.truncf %11 : vector<8x128xf32> to vector<8x128xbf16>
    %c0_7 = arith.constant 0 : index
    %c0_8 = arith.constant 0 : index
    %c0_9 = arith.constant 0 : index
    %13 = vector.load %arg4[%c0_7, %c0_8, %c0_9] : memref<4x128x128xbf16, #tpu.memory_space<vmem>>, vector<1x128x128xbf16>
    %14 = vector.shape_cast %13 : vector<1x128x128xbf16> to vector<128x128xbf16>
    %cst_10 = arith.constant dense<0.000000e+00> : vector<8x128xf32>
    %15 = tpu.matmul %12, %14, %cst_10 {dimension_numbers = #tpu.dot_dimension_numbers<[1], [0], [0], [1], [0, 0, 1, 1], [], []>} : vector<8x128xbf16>, vector<128x128xbf16>, vector<8x128xf32> -> vector<8x128xf32>
    %c0_11 = arith.constant 0 : index
    %c0_12 = arith.constant 0 : index
    %16 = vector.load %arg5[%c0_11, %c0_12] : memref<4x128xf32, #tpu.memory_space<vmem>>, vector<1x128xf32>
    %17 = vector.shape_cast %16 : vector<1x128xf32> to vector<128xf32>
    %18 = vector.shape_cast %17 : vector<128xf32> to vector<1x128xf32>
    %19 = vector.broadcast %18 : vector<1x128xf32> to vector<8x128xf32>
    %20 = arith.addf %15, %19 : vector<8x128xf32>
    %cst_13 = arith.constant 0.000000e+00 : f32
    %21 = vector.broadcast %cst_13 : f32 to vector<8x128xf32>
    %22 = arith.cmpf ogt, %20, %21 : vector<8x128xf32>
    %cst_14 = arith.constant 0.00999999977 : f32
    %23 = vector.broadcast %cst_14 : f32 to vector<8x128xf32>
    %24 = arith.mulf %23, %20 : vector<8x128xf32>
    %25 = arith.select %22, %20, %24 : vector<8x128xi1>, vector<8x128xf32>
    %26 = arith.truncf %25 : vector<8x128xf32> to vector<8x128xbf16>
    %c1 = arith.constant 1 : index
    %c0_15 = arith.constant 0 : index
    %c0_16 = arith.constant 0 : index
    %27 = vector.load %arg4[%c1, %c0_15, %c0_16] : memref<4x128x128xbf16, #tpu.memory_space<vmem>>, vector<1x128x128xbf16>
    %28 = vector.shape_cast %27 : vector<1x128x128xbf16> to vector<128x128xbf16>
    %cst_17 = arith.constant dense<0.000000e+00> : vector<8x128xf32>
    %29 = tpu.matmul %26, %28, %cst_17 {dimension_numbers = #tpu.dot_dimension_numbers<[1], [0], [0], [1], [0, 0, 1, 1], [], []>} : vector<8x128xbf16>, vector<128x128xbf16>, vector<8x128xf32> -> vector<8x128xf32>
    %c1_18 = arith.constant 1 : index
    %c0_19 = arith.constant 0 : index
    %30 = vector.load %arg5[%c1_18, %c0_19] : memref<4x128xf32, #tpu.memory_space<vmem>>, vector<1x128xf32>
    %31 = vector.shape_cast %30 : vector<1x128xf32> to vector<128xf32>
    %32 = vector.shape_cast %31 : vector<128xf32> to vector<1x128xf32>
    %33 = vector.broadcast %32 : vector<1x128xf32> to vector<8x128xf32>
    %34 = arith.addf %29, %33 : vector<8x128xf32>
    %cst_20 = arith.constant 0.000000e+00 : f32
    %35 = vector.broadcast %cst_20 : f32 to vector<8x128xf32>
    %36 = arith.cmpf ogt, %34, %35 : vector<8x128xf32>
    %cst_21 = arith.constant 0.00999999977 : f32
    %37 = vector.broadcast %cst_21 : f32 to vector<8x128xf32>
    %38 = arith.mulf %37, %34 : vector<8x128xf32>
    %39 = arith.select %36, %34, %38 : vector<8x128xi1>, vector<8x128xf32>
    %40 = arith.truncf %39 : vector<8x128xf32> to vector<8x128xbf16>
    %c2 = arith.constant 2 : index
    %c0_22 = arith.constant 0 : index
    %c0_23 = arith.constant 0 : index
    %41 = vector.load %arg4[%c2, %c0_22, %c0_23] : memref<4x128x128xbf16, #tpu.memory_space<vmem>>, vector<1x128x128xbf16>
    %42 = vector.shape_cast %41 : vector<1x128x128xbf16> to vector<128x128xbf16>
    %cst_24 = arith.constant dense<0.000000e+00> : vector<8x128xf32>
    %43 = tpu.matmul %40, %42, %cst_24 {dimension_numbers = #tpu.dot_dimension_numbers<[1], [0], [0], [1], [0, 0, 1, 1], [], []>} : vector<8x128xbf16>, vector<128x128xbf16>, vector<8x128xf32> -> vector<8x128xf32>
    %c2_25 = arith.constant 2 : index
    %c0_26 = arith.constant 0 : index
    %44 = vector.load %arg5[%c2_25, %c0_26] : memref<4x128xf32, #tpu.memory_space<vmem>>, vector<1x128xf32>
    %45 = vector.shape_cast %44 : vector<1x128xf32> to vector<128xf32>
    %46 = vector.shape_cast %45 : vector<128xf32> to vector<1x128xf32>
    %47 = vector.broadcast %46 : vector<1x128xf32> to vector<8x128xf32>
    %48 = arith.addf %43, %47 : vector<8x128xf32>
    %cst_27 = arith.constant 0.000000e+00 : f32
    %49 = vector.broadcast %cst_27 : f32 to vector<8x128xf32>
    %50 = arith.cmpf ogt, %48, %49 : vector<8x128xf32>
    %cst_28 = arith.constant 0.00999999977 : f32
    %51 = vector.broadcast %cst_28 : f32 to vector<8x128xf32>
    %52 = arith.mulf %51, %48 : vector<8x128xf32>
    %53 = arith.select %50, %48, %52 : vector<8x128xi1>, vector<8x128xf32>
    %54 = arith.truncf %53 : vector<8x128xf32> to vector<8x128xbf16>
    %c3 = arith.constant 3 : index
    %c0_29 = arith.constant 0 : index
    %c0_30 = arith.constant 0 : index
    %55 = vector.load %arg4[%c3, %c0_29, %c0_30] : memref<4x128x128xbf16, #tpu.memory_space<vmem>>, vector<1x128x128xbf16>
    %56 = vector.shape_cast %55 : vector<1x128x128xbf16> to vector<128x128xbf16>
    %cst_31 = arith.constant dense<0.000000e+00> : vector<8x128xf32>
    %57 = tpu.matmul %54, %56, %cst_31 {dimension_numbers = #tpu.dot_dimension_numbers<[1], [0], [0], [1], [0, 0, 1, 1], [], []>} : vector<8x128xbf16>, vector<128x128xbf16>, vector<8x128xf32> -> vector<8x128xf32>
    %c3_32 = arith.constant 3 : index
    %c0_33 = arith.constant 0 : index
    %58 = vector.load %arg5[%c3_32, %c0_33] : memref<4x128xf32, #tpu.memory_space<vmem>>, vector<1x128xf32>
    %59 = vector.shape_cast %58 : vector<1x128xf32> to vector<128xf32>
    %60 = vector.shape_cast %59 : vector<128xf32> to vector<1x128xf32>
    %61 = vector.broadcast %60 : vector<1x128xf32> to vector<8x128xf32>
    %62 = arith.addf %57, %61 : vector<8x128xf32>
    %cst_34 = arith.constant 0.000000e+00 : f32
    %63 = vector.broadcast %cst_34 : f32 to vector<8x128xf32>
    %64 = arith.cmpf ogt, %62, %63 : vector<8x128xf32>
    %cst_35 = arith.constant 0.00999999977 : f32
    %65 = vector.broadcast %cst_35 : f32 to vector<8x128xf32>
    %66 = arith.mulf %65, %62 : vector<8x128xf32>
    %67 = arith.select %64, %62, %66 : vector<8x128xi1>, vector<8x128xf32>
    %c0_36 = arith.constant 0 : index
    %c0_37 = arith.constant 0 : index
    %68 = vector.load %arg6[%c0_36, %c0_37] : memref<8x128xf32, #tpu.memory_space<vmem>>, vector<8x128xf32>
    tpu.vector_store %arg6[%c0_36, %c0_37], %67 {strides = array<i32>} : memref<8x128xf32, #tpu.memory_space<vmem>>, vector<8x128xf32>,
    return
  }
  func.func @transform_0(%arg0: i32) -> (i32, i32) {
    %c0_i32 = arith.constant 0 : i32
    %c0_i32_0 = arith.constant 0 : i32
    return %arg0, %c0_i32 : i32, i32
  }
  func.func @transform_1(%arg0: i32) -> (i32, i32) {
    %c0_i32 = arith.constant 0 : i32
    %c0_i32_0 = arith.constant 0 : i32
    %c0_i32_1 = arith.constant 0 : i32
    return %c0_i32, %c0_i32_0 : i32, i32
  }
  func.func @transform_2(%arg0: i32) -> (i32, i32) {
    %c0_i32 = arith.constant 0 : i32
    %c0_i32_0 = arith.constant 0 : i32
    %c0_i32_1 = arith.constant 0 : i32
    return %c0_i32, %c0_i32_0 : i32, i32
  }
  func.func @transform_3(%arg0: i32) -> (i32, i32, i32) {
    %c0_i32 = arith.constant 0 : i32
    %c0_i32_0 = arith.constant 0 : i32
    %c0_i32_1 = arith.constant 0 : i32
    %c0_i32_2 = arith.constant 0 : i32
    return %c0_i32, %c0_i32_0, %c0_i32_1 : i32, i32, i32
  }
  func.func @transform_4(%arg0: i32) -> (i32, i32) {
    %c0_i32 = arith.constant 0 : i32
    %c0_i32_0 = arith.constant 0 : i32
    %c0_i32_1 = arith.constant 0 : i32
    return %c0_i32, %c0_i32_0 : i32, i32
  }
  func.func @transform_5(%arg0: i32) -> (i32, i32) {
    %c0_i32 = arith.constant 0 : i32
    %c0_i32_0 = arith.constant 0 : i32
    return %arg0, %c0_i32 : i32, i32
  }
}

</mosaic_0001>

<bundles_post_ra>
// kernel: vitalsign_feature_mel_thickness.1
= control target key start
LH: loop header
LB: loop body
LE: loop exit
PB: predicated region body
PF: predicated region fallthrough
CT: control target
= control target key end

     0   :  { %10 = vsyncpa [#allocation3], 0  ;;  %s1048_s0 = inlined_call_operand.hbm [shape: f32[8,14], index: 0, kind: input, shape index: {}]   ;;  %s1049_s1 = inlined_call_operand.hbm [shape: bf16[14,128], index: 1, kind: input, shape index: {}]   ;;  %s1050_s2 = inlined_call_operand.vmem [shape: f32[1,128], index: 2, kind: input, shape index: {}]   ;;  %s1051_s3 = inlined_call_operand.hbm [shape: bf16[4,128,128], index: 3, kind: input, shape index: {}]   ;;  %s1052_s4 = inlined_call_operand.vmem [shape: f32[4,128], index: 4, kind: input, shape index: {}]   ;;  %s1053_s5 = inlined_call_operand.hbm [shape: f32[8,128], index: 5, kind: output, shape index: {}]  }
   0x1   :  { %11 = vsyncpa [#allocation6], 0 }
   0x2   :  { %12 = vsyncpa [#allocation4], 0  ;;  %s898_s18 = smov [#allocation5]   ;;  %s804_s22 = scalar_lea.hbm %s1049_s1, 128 }
   0x3   :  { %s28_s19 = sshll.u32 %s898_s18, 4  ;;  %p805_p0 = scmp.ne.s32.totalorder %s1049_s1, %s804_s22  ;;  %s29_s19 = int_to_ptr.vmem [resolvable:$true] %s28_s19 }
   0x4   :  { %p808_p1 = scmp.lt.u32.totalorder %s804_s22, %s1049_s1 }
   0x6   :  { %p810_p2 = pnand %p808_p1, %p805_p0 }
   0x8   :  { %813 = shalt.err (!%p810_p2)
}
   0x9   :  { %s814_s27 = scalar_lea.vmem %s29_s19, 128  ;;  %p819_p4 = scmp.lt.s32.totalorder %s29_s19, %s29_s19 }
   0xa   :  { %p815_p3 = scmp.ne.s32.totalorder %s29_s19, %s814_s27  ;;  %p820_p5 = scmp.lt.s32.totalorder %s814_s27, %s814_s27 }
   0xc   :  { %p821_p6 = por %p820_p5, %p819_p4 }
   0xe   :  { %p822_p7 = pnand %p821_p6, %p815_p3 }
  0x10   :  { %825 = shalt.err (!%p822_p7)
}
  0x11   :  { %s899_s28 = smov 64   ;;  %s900_s29 = smov 4  }
  0x12   :  { %34 = dma.hbm_to_vmem [thread:$0]  %s1049_s1, 128, %s29_s19, [#allocation6], %s899_s28, %s899_s28, %s900_s29  }
  0x13   :  { %s901_s7 = smov [#allocation2]   ;;  %s902_s9 = smov [#allocation7]  }
  0x14   :  { %s19_s8 = sshll.u32 %s901_s7, 4  ;;  %s42_s10 = sshll.u32 %s902_s9, 4  ;;  %s20_s8 = int_to_ptr.vmem [resolvable:$true] %s19_s8  ;;  %s43_s10 = int_to_ptr.vmem [resolvable:$true] %s42_s10 }
  0x15   :  { %s826_s13 = scalar_lea.hbm %s1048_s0, 128 }
  0x16   :  { %p827_p8 = scmp.ne.s32.totalorder %s1048_s0, %s826_s13  ;;  %p830_p9 = scmp.lt.u32.totalorder %s826_s13, %s1048_s0 }
  0x18   :  { %p832_p10 = pnand %p830_p9, %p827_p8 }
  0x1a   :  { %835 = shalt.err (!%p832_p10)
}
  0x1b   :  { %s836_s1 = scalar_lea.vmem %s20_s8, 128  ;;  %p841_p12 = scmp.lt.s32.totalorder %s20_s8, %s20_s8 }
  0x1c   :  { %p837_p11 = scmp.ne.s32.totalorder %s20_s8, %s836_s1  ;;  %p842_p13 = scmp.lt.s32.totalorder %s836_s1, %s836_s1 }
  0x1e   :  { %p843_p0 = por %p842_p13, %p841_p12 }
  0x20   :  { %p844_p1 = pnand %p843_p0, %p837_p11 }
  0x22   :  { %847 = shalt.err (!%p844_p1)
}
  0x23   :  { %22 = dma.hbm_to_vmem [thread:$0]  %s1048_s0, 128, %s20_s8, [#allocation3]  }
  0x24   :  { %s848_s22 = scalar_lea.hbm %s1051_s3, 4096 }
  0x25   :  { %p849_p2 = scmp.ne.s32.totalorder %s1051_s3, %s848_s22  ;;  %p852_p3 = scmp.lt.u32.totalorder %s848_s22, %s1051_s3 }
  0x27   :  { %p854_p4 = pnand %p852_p3, %p849_p2 }
  0x29   :  { %857 = shalt.err (!%p854_p4)
}
  0x2a   :  { %s858_s27 = scalar_lea.vmem %s43_s10, 4096  ;;  %p863_p6 = scmp.lt.s32.totalorder %s43_s10, %s43_s10 }
  0x2b   :  { %p859_p5 = scmp.ne.s32.totalorder %s43_s10, %s858_s27  ;;  %p864_p7 = scmp.lt.s32.totalorder %s858_s27, %s858_s27 }
  0x2d   :  { %p865_p8 = por %p864_p7, %p863_p6 }
  0x2f   :  { %p866_p9 = pnand %p865_p8, %p859_p5 }
  0x31   :  { %869 = shalt.err (!%p866_p9)
}
  0x32   :  { %48 = dma.hbm_to_vmem [thread:$0]  %s1051_s3, 4096, %s43_s10, [#allocation6], %s899_s28, %s899_s28, %s900_s29  }
  0x33   :  { %892 = dma.done.wait [#allocation3], 128  }
  0x34   :  { %893 = vsyncadd [#allocation3], 4294967168 }
  0x35   :  { %894 = dma.done.wait [#allocation6], 4224  }
  0x36   :  { %895 = vsyncadd [#allocation6], 4294963072  ;;  %v903_v0 = vmov 0.0   ;;  %vm904_vm0 = vmmov 0   ;;  %vm81_vm1 = vcmask 1046528   ;;  %v61_v2 = vld [vmem:[#allocation2] sm:$0xff] }
  0x37   :  { %677 = vmatprep.subr.bf16.mxu0 %v903_v0  ;;  %679 = vmatprep.mubr.msk.bf16.mxu0 %vm904_vm0, %v903_v0  ;;  %v771_v1 = vld [vmem:[#allocation5] sm:$0x7f]   ;;  %v62_v4 = vpack.c.bf16 %v61_v2, %v61_v2  ;;  %v772_v5 = vld [vmem:[#allocation7] sm:$0xff]   ;;  %vm77_vm2 = vcmask 113664   ;;  %v773_v6 = vld [vmem:[#allocation7 + $0x8] sm:$0xff]   ;;  %s905_s12 = smov [#allocation8]  }
  0x38   :  { %683 = vmatprep.subr.bf16.mxu1 %v903_v0  ;;  %699 = vmatprep.mubr.msk.bf16.mxu1 %vm904_vm0, %v903_v0  ;;  %v83_v3 = vsel %vm81_vm1, %v771_v1, 0  ;;  %v774_v7 = vld [vmem:[#allocation7 + $0x10] sm:$0xff]   ;;  %v775_v8 = vld [vmem:[#allocation7 + $0x18] sm:$0xff]   ;;  %v776_v9 = vld [vmem:[#allocation7 + $0x20] sm:$0xff]   ;;  %s590_s13 = sshll.u32 %s905_s12, 4  ;;  %s591_s13 = int_to_ptr.vmem [resolvable:$true] %s590_s13 }
  0x39   :  { %678 = vmatpush3.bf16.msra.mxu0 %v83_v3  ;;  %684 = vmatpush3.bf16.msra.mxu1 %v772_v5  ;;  %v777_v10 = vld [vmem:[#allocation7 + $0x28] sm:$0xff]   ;;  %v778_v11 = vld [vmem:[#allocation7 + $0x30] sm:$0xff]   ;;  %v779_v12 = vld [vmem:[#allocation7 + $0x38] sm:$0xff]   ;;  %s870_s14 = scalar_lea.vmem %s591_s13, 128  ;;  %p875_p11 = scmp.lt.s32.totalorder %s591_s13, %s591_s13 }
  0x3a   :  { %703 = vmatprep.subr.bf16.mxu0 %v903_v0  ;;  %685 = vmatprep.subr.bf16.mxu1 %v903_v0  ;;  %v780_v13 = vld [vmem:[#allocation7 + $0x40] sm:$0xff]   ;;  %v781_v14 = vld [vmem:[#allocation7 + $0x48] sm:$0xff]   ;;  %v782_v15 = vld [vmem:[#allocation7 + $0x50] sm:$0xff]   ;;  %p871_p10 = scmp.ne.s32.totalorder %s591_s13, %s870_s14  ;;  %p876_p12 = scmp.lt.s32.totalorder %s870_s14, %s870_s14 }
  0x3b   :  { %v783_v16 = vld [vmem:[#allocation7 + $0x58] sm:$0xff]   ;;  %v784_v17 = vld [vmem:[#allocation7 + $0x60] sm:$0xff]   ;;  %v785_v18 = vld [vmem:[#allocation7 + $0x68] sm:$0xff]  }
  0x3c   :  { %680 = vmatmul.mubr.msk.bf16.vlgmr.msra.gmra.mrb[0].mxu0 %vm77_vm2, %v62_v4  ;;  %v600_v19 = vld [vmem:[%s1050_s2] ss:$0 sm:$0xff]  ;;  %v787_v29 = vld [vmem:[#allocation7 + $0x78] sm:$0xff]   ;;  %v788_v30 = vld [vmem:[#allocation7 + $0x80] sm:$0xff]   ;;  %p877_p13 = por %p876_p12, %p875_p11 }
  0x3d   :  { %719 = vmatprep.mubr.msk.bf16.mxu0 %vm904_vm0, %v903_v0  ;;  %686 = vmatpush3.bf16.msra.mxu1 %v773_v6  ;;  %v786_v28 = vld [vmem:[#allocation7 + $0x70] sm:$0xff]   ;;  %v789_v31 = vld [vmem:[#allocation7 + $0x88] sm:$0xff]   ;;  %v791_v33 = vld [vmem:[#allocation7 + $0x98] sm:$0xff]  }
  0x3e   :  { %687 = vmatprep.subr.bf16.mxu1 %v903_v0  ;;  %704 = vmatpush3.bf16.msra.mxu0 %v780_v13  ;;  %v790_v32 = vld [vmem:[#allocation7 + $0x90] sm:$0xff]   ;;  %v792_v34 = vld [vmem:[#allocation7 + $0xa0] sm:$0xff]   ;;  %v793_v35 = vld [vmem:[#allocation7 + $0xa8] sm:$0xff]   ;;  %p878_p0 = pnand %p877_p13, %p871_p10 }
  0x3f   :  { %705 = vmatprep.subr.bf16.mxu0 %v903_v0  ;;  %v603_v36 = vld [vmem:[%s1052_s4] ss:$0 sm:$0xff]  ;;  %v795_v46 = vld [vmem:[#allocation7 + $0xb8] sm:$0xff]   ;;  %v796_v47 = vld [vmem:[#allocation7 + $0xc0] sm:$0xff]  }
  0x40   :  { %v794_v45 = vld [vmem:[#allocation7 + $0xb0] sm:$0xff]   ;;  %v797_v48 = vld [vmem:[#allocation7 + $0xc8] sm:$0xff]   ;;  %v799_v50 = vld [vmem:[#allocation7 + $0xd8] sm:$0xff]  }
  0x41   :  { %688 = vmatpush3.bf16.msra.mxu1 %v774_v7  ;;  %v798_v49 = vld [vmem:[#allocation7 + $0xd0] sm:$0xff]   ;;  %v800_v51 = vld [vmem:[#allocation7 + $0xe0] sm:$0xff]   ;;  %v801_v52 = vld [vmem:[#allocation7 + $0xe8] sm:$0xff]  }
  0x42   :  { %689 = vmatprep.subr.bf16.mxu1 %v903_v0  ;;  %706 = vmatpush3.bf16.msra.mxu0 %v781_v14  ;;  %v612_v53 = vld [vmem:[%s1052_s4 + $0x1] ss:$0 sm:$0xff]  ;;  %v803_v63 = vld [vmem:[#allocation7 + $0xf8] sm:$0xff]   ;;  %v621_v1 = vld [vmem:[%s1052_s4 + $0x2] ss:$0 sm:$0xff] }
  0x43   :  { %707 = vmatprep.subr.bf16.mxu0 %v903_v0  ;;  %v802_v62 = vld [vmem:[#allocation7 + $0xf0] sm:$0xff]  }
  0x45   :  { %690 = vmatpush3.bf16.msra.mxu1 %v775_v8 }
  0x46   :  { %691 = vmatprep.subr.bf16.mxu1 %v903_v0  ;;  %708 = vmatpush3.bf16.msra.mxu0 %v782_v15 }
  0x47   :  { %709 = vmatprep.subr.bf16.mxu0 %v903_v0 }
  0x49   :  { %692 = vmatpush3.bf16.msra.mxu1 %v776_v9 }
  0x4a   :  { %693 = vmatprep.subr.bf16.mxu1 %v903_v0  ;;  %710 = vmatpush3.bf16.msra.mxu0 %v783_v16 }
  0x4b   :  { %711 = vmatprep.subr.bf16.mxu0 %v903_v0 }
  0x4d   :  { %694 = vmatpush3.bf16.msra.mxu1 %v777_v10 }
  0x4e   :  { %695 = vmatprep.subr.bf16.mxu1 %v903_v0  ;;  %712 = vmatpush3.bf16.msra.mxu0 %v784_v17 }
  0x4f   :  { %713 = vmatprep.subr.bf16.mxu0 %v903_v0 }
  0x51   :  { %696 = vmatpush3.bf16.msra.mxu1 %v778_v11 }
  0x52   :  { %697 = vmatprep.subr.bf16.mxu1 %v903_v0  ;;  %714 = vmatpush3.bf16.msra.mxu0 %v785_v18 }
  0x53   :  { %715 = vmatprep.subr.bf16.mxu0 %v903_v0 }
  0x55   :  { %698 = vmatpush3.bf16.msra.mxu1 %v779_v12 }
  0x56   :  { %723 = vmatprep.subr.bf16.mxu1 %v903_v0  ;;  %716 = vmatpush3.bf16.msra.mxu0 %v786_v28 }
  0x57   :  { %717 = vmatprep.subr.bf16.mxu0 %v903_v0 }
  0x5a   :  { %718 = vmatpush3.bf16.msra.mxu0 %v787_v29 }
  0x5b   :  { %743 = vmatprep.subr.bf16.mxu0 %v903_v0 }
 0x10f   :  { %v119_v20 = vpop.f32.mrb[0].mxu0 }
 0x110   :  { %v120_v21 = vadd.f32 %v600_v19, %v119_v20  ;;  %v681_v22 = vpop.f32.mrb[1].mxu0 }
 0x111   :  { %v122_v23 = vpop.f32.mrb[2].mxu0 }
 0x112   :  { %vm125_vm3 = vcmp.gt.f32.partialorder %v120_v21, 0.0  ;;  %v126_v24 = vmul.f32 0.01, %v120_v21  ;;  %v682_v25 = vpop.f32.mrb[3].mxu0 }
 0x114   :  { %v127_v26 = vsel %vm125_vm3, %v120_v21, %v126_v24 }
 0x115   :  { %v128_v27 = vpack.c.bf16 %v127_v26, %v127_v26 }
 0x117   :  { %700 = vmatmul.mubr.bf16.vlgmr.msra.gmra.mrb[0].mxu1 %v128_v27 }
 0x118   :  { %739 = vmatprep.mubr.msk.bf16.mxu1 %vm904_vm0, %v903_v0  ;;  %724 = vmatpush3.bf16.msra.mxu1 %v788_v30 }
 0x119   :  { %725 = vmatprep.subr.bf16.mxu1 %v903_v0 }
 0x11c   :  { %726 = vmatpush3.bf16.msra.mxu1 %v789_v31 }
 0x11d   :  { %727 = vmatprep.subr.bf16.mxu1 %v903_v0 }
 0x120   :  { %728 = vmatpush3.bf16.msra.mxu1 %v790_v32 }
 0x121   :  { %729 = vmatprep.subr.bf16.mxu1 %v903_v0 }
 0x124   :  { %730 = vmatpush3.bf16.msra.mxu1 %v791_v33 }
 0x125   :  { %731 = vmatprep.subr.bf16.mxu1 %v903_v0 }
 0x128   :  { %732 = vmatpush3.bf16.msra.mxu1 %v792_v34 }
 0x129   :  { %733 = vmatprep.subr.bf16.mxu1 %v903_v0 }
 0x12c   :  { %734 = vmatpush3.bf16.msra.mxu1 %v793_v35 }
 0x12d   :  { %735 = vmatprep.subr.bf16.mxu1 %v903_v0 }
 0x130   :  { %736 = vmatpush3.bf16.msra.mxu1 %v794_v45 }
 0x131   :  { %737 = vmatprep.subr.bf16.mxu1 %v903_v0 }
 0x134   :  { %738 = vmatpush3.bf16.msra.mxu1 %v795_v46 }
 0x1ea   :  { %v232_v37 = vpop.f32.mrb[0].mxu1 }
 0x1eb   :  { %v233_v38 = vadd.f32 %v603_v36, %v232_v37  ;;  %v701_v39 = vpop.f32.mrb[1].mxu1 }
 0x1ec   :  { %v235_v40 = vpop.f32.mrb[2].mxu1 }
 0x1ed   :  { %vm238_vm4 = vcmp.gt.f32.partialorder %v233_v38, 0.0  ;;  %v239_v41 = vmul.f32 0.01, %v233_v38  ;;  %v702_v42 = vpop.f32.mrb[3].mxu1 }
 0x1ef   :  { %v240_v43 = vsel %vm238_vm4, %v233_v38, %v239_v41 }
 0x1f0   :  { %v241_v44 = vpack.c.bf16 %v240_v43, %v240_v43 }
 0x1f2   :  { %720 = vmatmul.mubr.bf16.vlgmr.msra.gmra.mrb[4].mxu0 %v241_v44 }
 0x1f3   :  { %759 = vmatprep.mubr.msk.bf16.mxu0 %vm904_vm0, %v903_v0  ;;  %744 = vmatpush3.bf16.msra.mxu0 %v796_v47 }
 0x1f4   :  { %745 = vmatprep.subr.bf16.mxu0 %v903_v0 }
 0x1f7   :  { %746 = vmatpush3.bf16.msra.mxu0 %v797_v48 }
 0x1f8   :  { %747 = vmatprep.subr.bf16.mxu0 %v903_v0 }
 0x1fb   :  { %748 = vmatpush3.bf16.msra.mxu0 %v798_v49 }
 0x1fc   :  { %749 = vmatprep.subr.bf16.mxu0 %v903_v0 }
 0x1ff   :  { %750 = vmatpush3.bf16.msra.mxu0 %v799_v50 }
 0x200   :  { %751 = vmatprep.subr.bf16.mxu0 %v903_v0 }
 0x203   :  { %752 = vmatpush3.bf16.msra.mxu0 %v800_v51 }
 0x204   :  { %753 = vmatprep.subr.bf16.mxu0 %v903_v0 }
 0x207   :  { %754 = vmatpush3.bf16.msra.mxu0 %v801_v52 }
 0x208   :  { %755 = vmatprep.subr.bf16.mxu0 %v903_v0 }
 0x20b   :  { %756 = vmatpush3.bf16.msra.mxu0 %v802_v62 }
 0x20c   :  { %757 = vmatprep.subr.bf16.mxu0 %v903_v0  ;;  %v630_v0 = vld [vmem:[%s1052_s4 + $0x3] ss:$0 sm:$0xff] }
 0x20f   :  { %758 = vmatpush3.bf16.msra.mxu0 %v803_v63 }
 0x2c5   :  { %v346_v54 = vpop.f32.mrb[4].mxu0 }
 0x2c6   :  { %v347_v55 = vadd.f32 %v612_v53, %v346_v54  ;;  %v721_v56 = vpop.f32.mrb[5].mxu0 }
 0x2c7   :  { %v349_v57 = vpop.f32.mrb[6].mxu0 }
 0x2c8   :  { %vm352_vm5 = vcmp.gt.f32.partialorder %v347_v55, 0.0  ;;  %v353_v58 = vmul.f32 0.01, %v347_v55  ;;  %v722_v59 = vpop.f32.mrb[7].mxu0 }
 0x2ca   :  { %v354_v60 = vsel %vm352_vm5, %v347_v55, %v353_v58 }
 0x2cb   :  { %v355_v61 = vpack.c.bf16 %v354_v60, %v354_v60 }
 0x2cd   :  { %740 = vmatmul.mubr.bf16.vlgmr.msra.gmra.mrb[4].mxu1 %v355_v61 }
 0x3a0   :  { %v460_v2 = vpop.f32.mrb[4].mxu1 }
 0x3a1   :  { %v461_v3 = vadd.f32 %v621_v1, %v460_v2  ;;  %v741_v4 = vpop.f32.mrb[5].mxu1 }
 0x3a2   :  { %v463_v5 = vpop.f32.mrb[6].mxu1 }
 0x3a3   :  { %vm466_vm6 = vcmp.gt.f32.partialorder %v461_v3, 0.0  ;;  %v467_v6 = vmul.f32 0.01, %v461_v3  ;;  %v742_v7 = vpop.f32.mrb[7].mxu1 }
 0x3a5   :  { %v468_v8 = vsel %vm466_vm6, %v461_v3, %v467_v6 }
 0x3a6   :  { %v469_v9 = vpack.c.bf16 %v468_v8, %v468_v8 }
 0x3a8   :  { %760 = vmatmul.mubr.bf16.vlgmr.msra.gmra.mrb[8].mxu0 %v469_v9 }
 0x47b   :  { %v574_v10 = vpop.f32.mrb[8].mxu0 }
 0x47c   :  { %v575_v11 = vadd.f32 %v630_v0, %v574_v10  ;;  %v761_v12 = vpop.f32.mrb[9].mxu0 }
 0x47d   :  { %v577_v13 = vpop.f32.mrb[10].mxu0 }
 0x47e   :  { %v581_v14 = vmul.f32 0.01, %v575_v11  ;;  %v762_v15 = vpop.f32.mrb[11].mxu0  ;;  %vm580_vm7 = vcmp.gt.f32.partialorder %v575_v11, 0.0 }
 0x480   :  { %v582_v16 = vsel %vm580_vm7, %v575_v11, %v581_v14 }
 0x481   :  { %583 = vst [vmem:[#allocation8] sm:$0xff] %v582_v16 }
 0x482   :  { %881 = shalt.err (!%p878_p0)
}
 0x483   :  { %s882_s16 = scalar_lea.hbm %s1053_s5, 128 }
 0x484   :  { %p883_p1 = scmp.ne.s32.totalorder %s1053_s5, %s882_s16  ;;  %p886_p2 = scmp.lt.u32.totalorder %s882_s16, %s1053_s5 }
 0x486   :  { %p888_p3 = pnand %p886_p2, %p883_p1 }
 0x488   :  { %891 = shalt.err (!%p888_p3)
}
 0x489   :  { %593 = dma.vmem_to_hbm [thread:$0]  %s591_s13, 128, %s1053_s5, [#allocation4]  }
 0x48a   :  { %896 = dma.done.wait [#allocation4], 128  }
 0x48b   :  { %897 = vsyncadd [#allocation4], 4294967168 }
 0x48c   :  { %597 = vsyncpa [#allocation3], 1 }
 0x48d   :  { %598 = vsyncpa [#allocation6], 1 }
 0x48e   :  { %599 = vsyncpa [#allocation4], 1 }

</bundles_post_ra>
